<compile_context>
chip_gen: v7x
topology: tpu7x:2x2x1
jax: 0.10.0
libtpu: 0.0.40
codegen_flags: <defaults>
</compile_context>

<pallas_src>
import functools

import jax
import jax.numpy as jnp
from jax.experimental import pallas as pl
from jax.experimental.pallas import tpu as pltpu


def _round_up(n, m):
    return ((n + m - 1) // m) * m


# ----------------------------------------------------------------------------
# Kernels
# ----------------------------------------------------------------------------
def _lstm_body(xh_bf16, w_bf16, bias_f32, c, hidden):
    """Fused LSTMCell math: one bf16 MXU matmul, f32 gate math."""
    gates = jnp.dot(xh_bf16, w_bf16, preferred_element_type=jnp.float32)
    gates = gates + bias_f32
    # PyTorch gate order (i, f, g, o); `hidden` is a multiple of 128 so every
    # slice below starts on a 128-lane boundary (free vreg views).
    i = jax.nn.sigmoid(gates[:, 0 * hidden:1 * hidden])
    f = jax.nn.sigmoid(gates[:, 1 * hidden:2 * hidden])
    g = jnp.tanh(gates[:, 2 * hidden:3 * hidden])
    o = jax.nn.sigmoid(gates[:, 3 * hidden:4 * hidden])
    c_new = f * c + i * g
    h_new = o * jnp.tanh(c_new)
    return h_new, c_new


def _zoneout_eval_kernel(xh_ref, h_ref, c_ref, w_ref, b_ref,
                         h_out_ref, c_out_ref, *, zoneout_rate, hidden):
    h = h_ref[...]
    c = c_ref[...]
    h_new, c_new = _lstm_body(xh_ref[...], w_ref[...], b_ref[...], c, hidden)
    p = jnp.float32(zoneout_rate)
    # (1-p)*new + p*old  ==  new + p*(old - new): one mul + one sub + one add.
    h_out_ref[...] = h_new + p * (h - h_new)
    c_out_ref[...] = c_new + p * (c - c_new)


def _zoneout_train_kernel(xh_ref, h_ref, c_ref, w_ref, b_ref, mh_ref, mc_ref,
                          h_out_ref, c_out_ref, *, hidden):
    h = h_ref[...]
    c = c_ref[...]
    h_new, c_new = _lstm_body(xh_ref[...], w_ref[...], b_ref[...], c, hidden)
    # mask==1 -> keep old state, mask==0 -> new state.  Single VPU select.
    h_out_ref[...] = jnp.where(mh_ref[...] >= 0.5, h, h_new)
    c_out_ref[...] = jnp.where(mc_ref[...] >= 0.5, c, c_new)


# ----------------------------------------------------------------------------
# Parameter preparation (hoisted, done once)
# ----------------------------------------------------------------------------
def prepare_zoneout_lstm_params(params, input_size, hidden_size):
    """Transpose / concat / pad / bf16-cast LSTMCell params once.

    params: PyTorch LSTMCell layout: w_ih (4H, I), w_hh (4H, H),
            b_ih (4H,), b_hh (4H,), gate order (i, f, g, o).
    Returns a dict with:
      w:    (I + Hp, 4*Hp) bf16 fused weight  (Hp = H rounded up to 128)
      bias: (1, 4*Hp) f32 folded bias
    """
    H = hidden_size
    H_pad = _round_up(H, 128)

    w_ih = jnp.asarray(params["w_ih"], jnp.float32)   # (4H, I)
    w_hh = jnp.asarray(params["w_hh"], jnp.float32)   # (4H, H)
    bias = (jnp.asarray(params["b_ih"], jnp.float32)
            + jnp.asarray(params["b_hh"], jnp.float32))  # (4H,)

    def pad_gate_rows(w, in_dim):
        # (4H, in_dim) -> (4*H_pad, in_dim), zero-padding each gate block.
        w4 = w.reshape(4, H, in_dim)
        w4 = jnp.pad(w4, ((0, 0), (0, H_pad - H), (0, 0)))
        return w4.reshape(4 * H_pad, in_dim)

    w_ih_p = pad_gate_rows(w_ih, input_size)                  # (4Hp, I)
    w_hh_p = pad_gate_rows(w_hh, H)                           # (4Hp, H)
    w_hh_p = jnp.pad(w_hh_p, ((0, 0), (0, H_pad - H)))        # (4Hp, Hp)

    w_fused = jnp.concatenate([w_ih_p, w_hh_p], axis=1).T     # (I+Hp, 4Hp)
    w_fused = w_fused.astype(jnp.bfloat16)

    bias4 = bias.reshape(4, H)
    bias4 = jnp.pad(bias4, ((0, 0), (0, H_pad - H)))
    bias_p = bias4.reshape(1, 4 * H_pad).astype(jnp.float32)

    return {
        "w": w_fused,
        "bias": bias_p,
        "input_size": int(input_size),
        "hidden": int(H),
        "hidden_pad": int(H_pad),
    }


def make_zoneout_masks(key, prob, shape):
    """Training-mode Bernoulli(p) masks for (h, c), generated with jax.random."""
    kh, kc = jax.random.split(key)
    mask_h = jax.random.bernoulli(kh, prob, shape).astype(jnp.float32)
    mask_c = jax.random.bernoulli(kc, prob, shape).astype(jnp.float32)
    return mask_h, mask_c


# ----------------------------------------------------------------------------
# Wrapper
# ----------------------------------------------------------------------------
def zoneout_lstm_cell(x, hidden, prep, zoneout_rate=0.1, *, training=False,
                      rng_key=None):
    """ZoneOutCell(LSTMCell) forward.

    Args:
      x: (B, I) input.
      hidden: tuple (h, c), each (B, H).
      prep: output of prepare_zoneout_lstm_params().
      zoneout_rate: float in [0, 1].
      training: stochastic zoneout masks if True, deterministic blend otherwise.
      rng_key: jax PRNG key for the training masks.
    Returns:
      (h_out, c_out), each (B, H) float32.
    """
    if zoneout_rate > 1.0 or zoneout_rate < 0.0:
        raise ValueError(
            "zoneout probability must be in the range from 0.0 to 1.0.")
    h, c = hidden
    B, I = x.shape
    H = prep["hidden"]
    H_pad = prep["hidden_pad"]
    assert I == prep["input_size"]
    K = I + H_pad

    # Batch tiling: sublane-aligned, pipelined tile of up to 256 rows.
    if B <= 256:
        B_pad = _round_up(B, 8)
        TB = B_pad
    else:
        TB = 256
        B_pad = _round_up(B, TB)

    def pad2(a, rows, cols):
        return jnp.pad(a, ((0, rows - a.shape[0]), (0, cols - a.shape[1])))

    x_p = pad2(jnp.asarray(x, jnp.float32), B_pad, I)
    h_p = pad2(jnp.asarray(h, jnp.float32), B_pad, H_pad)
    c_p = pad2(jnp.asarray(c, jnp.float32), B_pad, H_pad)
    xh = jnp.concatenate([x_p, h_p], axis=-1).astype(jnp.bfloat16)  # (B_pad, K)

    w = prep["w"]        # (K, 4*H_pad) bf16, VMEM-resident constant block
    bias = prep["bias"]  # (1, 4*H_pad) f32

    def row_spec():
        return pl.BlockSpec((TB, H_pad), lambda b: (b, 0))

    in_specs = [
        pl.BlockSpec((TB, K), lambda b: (b, 0)),          # xh
        row_spec(),                                       # h
        row_spec(),                                       # c
        pl.BlockSpec((K, 4 * H_pad), lambda b: (0, 0)),   # fused weight
        pl.BlockSpec((1, 4 * H_pad), lambda b: (0, 0)),   # bias
    ]
    args = [xh, h_p, c_p, w, bias]

    if training:
        if rng_key is None:
            rng_key = jax.random.PRNGKey(0)
        mask_h, mask_c = make_zoneout_masks(rng_key, float(zoneout_rate),
                                            (B, H))
        args += [pad2(mask_h, B_pad, H_pad), pad2(mask_c, B_pad, H_pad)]
        in_specs += [row_spec(), row_spec()]
        kernel = functools.partial(_zoneout_train_kernel, hidden=H_pad)
    else:
        kernel = functools.partial(_zoneout_eval_kernel,
                                   zoneout_rate=float(zoneout_rate),
                                   hidden=H_pad)

    out_shape = (jax.ShapeDtypeStruct((B_pad, H_pad), jnp.float32),
                 jax.ShapeDtypeStruct((B_pad, H_pad), jnp.float32))
    out_specs = (row_spec(), row_spec())

    h_out, c_out = pl.pallas_call(
        kernel,
        out_shape=out_shape,
        grid_spec=pltpu.PrefetchScalarGridSpec(
            num_scalar_prefetch=0,
            grid=(B_pad // TB,),
            in_specs=in_specs,
            out_specs=out_specs,
        ),
        compiler_params=pltpu.CompilerParams(
            dimension_semantics=("parallel",),      # v7x: shard over 2 TCs
            vmem_limit_bytes=32 * 1024 * 1024,      # safe on v5e/v6e/v7x
        ),
    )(*args)
    return h_out[:B, :H], c_out[:B, :H]


# ----------------------------------------------------------------------------
# Reference + test
# ----------------------------------------------------------------------------
def _init_lstm_params(key, input_size, hidden_size):
    """PyTorch-style LSTMCell init: U(-1/sqrt(H), 1/sqrt(H))."""
    k = 1.0 / jnp.sqrt(jnp.float32(hidden_size))
    k1, k2, k3, k4 = jax.random.split(key, 4)
    return {
        "w_ih": jax.random.uniform(k1, (4 * hidden_size, input_size),
                                   jnp.float32, -k, k),
        "w_hh": jax.random.uniform(k2, (4 * hidden_size, hidden_size),
                                   jnp.float32, -k, k),
        "b_ih": jax.random.uniform(k3, (4 * hidden_size,), jnp.float32, -k, k),
        "b_hh": jax.random.uniform(k4, (4 * hidden_size,), jnp.float32, -k, k),
    }


def _lstm_reference(x, h, c, params):
    """Pure-JAX LSTMCell reference (bf16 matmul operands, f32 accumulation)."""
    w = jnp.concatenate([params["w_ih"], params["w_hh"]], axis=1).T  # (I+H, 4H)
    xh = jnp.concatenate([x, h], axis=-1)
    gates = jnp.dot(xh.astype(jnp.bfloat16), w.astype(jnp.bfloat16),
                    preferred_element_type=jnp.float32)
    gates = gates + params["b_ih"] + params["b_hh"]
    H = h.shape[-1]
    i = jax.nn.sigmoid(gates[:, 0 * H:1 * H])
    f = jax.nn.sigmoid(gates[:, 1 * H:2 * H])
    g = jnp.tanh(gates[:, 2 * H:3 * H])
    o = jax.nn.sigmoid(gates[:, 3 * H:4 * H])
    c_new = f * c + i * g
    h_new = o * jnp.tanh(c_new)
    return h_new, c_new


if __name__ == "__main__":
    B, I, H = 8, 16, 32          # ZoneOutCell(LSTMCell(16, 32)), batch 8
    zoneout_rate = 0.1

    root = jax.random.PRNGKey(0)
    kx, kh, kc, kp, kz = jax.random.split(root, 5)
    x = jax.random.normal(kx, (B, I), jnp.float32)
    h0 = jax.random.normal(kh, (B, H), jnp.float32)
    c0 = jax.random.normal(kc, (B, H), jnp.float32)
    params = _init_lstm_params(kp, I, H)
    prep = prepare_zoneout_lstm_params(params, I, H)   # hoisted, done once

    h_new_ref, c_new_ref = _lstm_reference(x, h0, c0, params)

    # Eval-mode (deterministic blend).
    h1, c1 = zoneout_lstm_cell(x, (h0, c0), prep, zoneout_rate, training=False)
    jax.block_until_ready((h1, c1))
    h_ref = zoneout_rate * h0 + (1 - zoneout_rate) * h_new_ref
    c_ref = zoneout_rate * c0 + (1 - zoneout_rate) * c_new_ref
    assert h1.shape == (B, H) and c1.shape == (B, H)
    assert jnp.allclose(h1, h_ref, atol=1e-3), "eval hidden state mismatch"
    assert jnp.allclose(c1, c_ref, atol=1e-3), "eval cell state mismatch"

    # Training-mode (stochastic zoneout masks).
    h1t, c1t = zoneout_lstm_cell(x, (h0, c0), prep, zoneout_rate,
                                 training=True, rng_key=kz)
    jax.block_until_ready((h1t, c1t))
    mh, mc = make_zoneout_masks(kz, zoneout_rate, (B, H))
    h_ref_t = mh * h0 + (1 - mh) * h_new_ref
    c_ref_t = mc * c0 + (1 - mc) * c_new_ref
    assert jnp.allclose(h1t, h_ref_t, atol=1e-3), "train hidden state mismatch"
    assert jnp.allclose(c1t, c_ref_t, atol=1e-3), "train cell state mismatch"

    print("KERNEL_OK")
</pallas_src>

<mosaic_0001>
module attributes {stable_mosaic.version = 11 : i64} {
  func.func @_zoneout_eval_kernel(%arg0: i32, %arg1: memref<8x144xbf16, #tpu.memory_space<vmem>>, %arg2: memref<8x128xf32, #tpu.memory_space<vmem>>, %arg3: memref<8x128xf32, #tpu.memory_space<vmem>>, %arg4: memref<144x512xbf16, #tpu.memory_space<vmem>>, %arg5: memref<1x512xf32, #tpu.memory_space<vmem>>, %arg6: memref<8x128xf32, #tpu.memory_space<vmem>>, %arg7: memref<8x128xf32, #tpu.memory_space<vmem>>) attributes {dimension_semantics = [#tpu.dimension_semantics<parallel>], iteration_bounds = array<i64: 1>, scalar_prefetch = 0 : i64, scratch_operands = 0 : i64, tpu.core_type = #tpu.core_type<tc>, window_params = [{transform_indices = @transform_0, window_bounds = array<i64: 8, 144>}, {transform_indices = @transform_1, window_bounds = array<i64: 8, 128>}, {transform_indices = @transform_2, window_bounds = array<i64: 8, 128>}, {pipeline_mode = #tpu.pipeline_mode<synchronous>, transform_indices = @transform_3, window_bounds = array<i64: 144, 512>}, {pipeline_mode = #tpu.pipeline_mode<synchronous>, transform_indices = @transform_4, window_bounds = array<i64: 1, 512>}, {transform_indices = @transform_5, window_bounds = array<i64: 8, 128>}, {transform_indices = @transform_6, window_bounds = array<i64: 8, 128>}]} {
    %c0 = arith.constant 0 : index
    %c0_0 = arith.constant 0 : index
    %0 = vector.load %arg2[%c0, %c0_0] : memref<8x128xf32, #tpu.memory_space<vmem>>, vector<8x128xf32>
    %c0_1 = arith.constant 0 : index
    %c0_2 = arith.constant 0 : index
    %1 = vector.load %arg3[%c0_1, %c0_2] : memref<8x128xf32, #tpu.memory_space<vmem>>, vector<8x128xf32>
    %c0_3 = arith.constant 0 : index
    %c0_4 = arith.constant 0 : index
    %2 = vector.load %arg1[%c0_3, %c0_4] : memref<8x144xbf16, #tpu.memory_space<vmem>>, vector<8x144xbf16>
    %c0_5 = arith.constant 0 : index
    %c0_6 = arith.constant 0 : index
    %3 = vector.load %arg4[%c0_5, %c0_6] : memref<144x512xbf16, #tpu.memory_space<vmem>>, vector<144x512xbf16>
    %c0_7 = arith.constant 0 : index
    %c0_8 = arith.constant 0 : index
    %4 = vector.load %arg5[%c0_7, %c0_8] : memref<1x512xf32, #tpu.memory_space<vmem>>, vector<1x512xf32>
    %cst = arith.constant dense<0.000000e+00> : vector<8x512xf32>
    %5 = tpu.matmul %2, %3, %cst {dimension_numbers = #tpu.dot_dimension_numbers<[1], [0], [0], [1], [0, 0, 1, 1], [], []>} : vector<8x144xbf16>, vector<144x512xbf16>, vector<8x512xf32> -> vector<8x512xf32>
    %6 = vector.broadcast %4 : vector<1x512xf32> to vector<8x512xf32>
    %7 = arith.addf %5, %6 : vector<8x512xf32>
    %8 = vector.extract_strided_slice %7 {offsets = [0, 0], sizes = [8, 128], strides = [1, 1]} : vector<8x512xf32> to vector<8x128xf32>
    %9 = arith.negf %8 : vector<8x128xf32>
    %10 = math.exp %9 : vector<8x128xf32>
    %cst_9 = arith.constant 1.000000e+00 : f32
    %11 = vector.broadcast %cst_9 : f32 to vector<8x128xf32>
    %12 = arith.addf %11, %10 : vector<8x128xf32>
    %13 = arith.divf %11, %12 : vector<8x128xf32>
    %14 = vector.extract_strided_slice %7 {offsets = [0, 128], sizes = [8, 128], strides = [1, 1]} : vector<8x512xf32> to vector<8x128xf32>
    %15 = arith.negf %14 : vector<8x128xf32>
    %16 = math.exp %15 : vector<8x128xf32>
    %cst_10 = arith.constant 1.000000e+00 : f32
    %17 = vector.broadcast %cst_10 : f32 to vector<8x128xf32>
    %18 = arith.addf %17, %16 : vector<8x128xf32>
    %19 = arith.divf %17, %18 : vector<8x128xf32>
    %20 = vector.extract_strided_slice %7 {offsets = [0, 256], sizes = [8, 128], strides = [1, 1]} : vector<8x512xf32> to vector<8x128xf32>
    %21 = math.tanh %20 : vector<8x128xf32>
    %22 = vector.extract_strided_slice %7 {offsets = [0, 384], sizes = [8, 128], strides = [1, 1]} : vector<8x512xf32> to vector<8x128xf32>
    %23 = arith.negf %22 : vector<8x128xf32>
    %24 = math.exp %23 : vector<8x128xf32>
    %cst_11 = arith.constant 1.000000e+00 : f32
    %25 = vector.broadcast %cst_11 : f32 to vector<8x128xf32>
    %26 = arith.addf %25, %24 : vector<8x128xf32>
    %27 = arith.divf %25, %26 : vector<8x128xf32>
    %28 = arith.mulf %19, %1 : vector<8x128xf32>
    %29 = arith.mulf %13, %21 : vector<8x128xf32>
    %30 = arith.addf %28, %29 : vector<8x128xf32>
    %31 = math.tanh %30 : vector<8x128xf32>
    %32 = arith.mulf %27, %31 : vector<8x128xf32>
    %33 = arith.subf %0, %32 : vector<8x128xf32>
    %cst_12 = arith.constant 1.000000e-01 : f32
    %34 = vector.broadcast %cst_12 : f32 to vector<8x128xf32>
    %35 = arith.mulf %34, %33 : vector<8x128xf32>
    %36 = arith.addf %32, %35 : vector<8x128xf32>
    %c0_13 = arith.constant 0 : index
    %c0_14 = arith.constant 0 : index
    %37 = vector.load %arg6[%c0_13, %c0_14] : memref<8x128xf32, #tpu.memory_space<vmem>>, vector<8x128xf32>
    tpu.vector_store %arg6[%c0_13, %c0_14], %36 {strides = array<i32>} : memref<8x128xf32, #tpu.memory_space<vmem>>, vector<8x128xf32>,
    %38 = arith.subf %1, %30 : vector<8x128xf32>
    %cst_15 = arith.constant 1.000000e-01 : f32
    %39 = vector.broadcast %cst_15 : f32 to vector<8x128xf32>
    %40 = arith.mulf %39, %38 : vector<8x128xf32>
    %41 = arith.addf %30, %40 : vector<8x128xf32>
    %c0_16 = arith.constant 0 : index
    %c0_17 = arith.constant 0 : index
    %42 = vector.load %arg7[%c0_16, %c0_17] : memref<8x128xf32, #tpu.memory_space<vmem>>, vector<8x128xf32>
    tpu.vector_store %arg7[%c0_16, %c0_17], %41 {strides = array<i32>} : memref<8x128xf32, #tpu.memory_space<vmem>>, vector<8x128xf32>,
    return
  }
  func.func @transform_0(%arg0: i32) -> (i32, i32) {
    %c0_i32 = arith.constant 0 : i32
    %c0_i32_0 = arith.constant 0 : i32
    return %arg0, %c0_i32 : i32, i32
  }
  func.func @transform_1(%arg0: i32) -> (i32, i32) {
    %c0_i32 = arith.constant 0 : i32
    %c0_i32_0 = arith.constant 0 : i32
    return %arg0, %c0_i32 : i32, i32
  }
  func.func @transform_2(%arg0: i32) -> (i32, i32) {
    %c0_i32 = arith.constant 0 : i32
    %c0_i32_0 = arith.constant 0 : i32
    return %arg0, %c0_i32 : i32, i32
  }
  func.func @transform_3(%arg0: i32) -> (i32, i32) {
    %c0_i32 = arith.constant 0 : i32
    %c0_i32_0 = arith.constant 0 : i32
    %c0_i32_1 = arith.constant 0 : i32
    return %c0_i32, %c0_i32_0 : i32, i32
  }
  func.func @transform_4(%arg0: i32) -> (i32, i32) {
    %c0_i32 = arith.constant 0 : i32
    %c0_i32_0 = arith.constant 0 : i32
    %c0_i32_1 = arith.constant 0 : i32
    return %c0_i32, %c0_i32_0 : i32, i32
  }
  func.func @transform_5(%arg0: i32) -> (i32, i32) {
    %c0_i32 = arith.constant 0 : i32
    %c0_i32_0 = arith.constant 0 : i32
    return %arg0, %c0_i32 : i32, i32
  }
  func.func @transform_6(%arg0: i32) -> (i32, i32) {
    %c0_i32 = arith.constant 0 : i32
    %c0_i32_0 = arith.constant 0 : i32
    return %arg0, %c0_i32 : i32, i32
  }
}

</mosaic_0001>

<bundles_post_ra>
// kernel: tpu_custom_call.1
= control target key start
LH: loop header
LB: loop body
LE: loop exit
PB: predicated region body
PF: predicated region fallthrough
CT: control target
= control target key end

     0   :  { %12 = vsyncpa [#allocation3], 0  ;;  %s860_s0 = inlined_call_operand.hbm [shape: bf16[8,144], index: 0, kind: input, shape index: {}]   ;;  %s861_s1 = inlined_call_operand.hbm [shape: f32[8,128], index: 1, kind: input, shape index: {}]   ;;  %s862_s2 = inlined_call_operand.hbm [shape: f32[8,128], index: 2, kind: input, shape index: {}]   ;;  %s863_s3 = inlined_call_operand.hbm [shape: bf16[144,512], index: 3, kind: input, shape index: {}]   ;;  %s864_s4 = inlined_call_operand.vmem [shape: f32[1,512], index: 4, kind: input, shape index: {}]   ;;  %s865_s5 = inlined_call_operand.hbm [shape: f32[8,128], index: 5, kind: output, shape index: {0}]   ;;  %s866_s6 = inlined_call_operand.hbm [shape: f32[8,128], index: 6, kind: output, shape index: {1}]  }
   0x1   :  { %13 = vsyncpa [#allocation6], 0 }
   0x2   :  { %14 = vsyncpa [#allocation9], 0 }
   0x3   :  { %15 = vsyncpa [#allocation4], 0 }
   0x4   :  { %16 = vsyncpa [#allocation12], 0  ;;  %s735_s21 = smov [#allocation5]   ;;  %s736_s23 = smov [#allocation2]  }
   0x5   :  { %s33_s22 = sshll.u32 %s735_s21, 4  ;;  %s23_s24 = sshll.u32 %s736_s23, 4  ;;  %s34_s22 = int_to_ptr.vmem [resolvable:$true] %s33_s22  ;;  %s24_s24 = int_to_ptr.vmem [resolvable:$true] %s23_s24 }
   0x6   :  { %s593_s27 = scalar_lea.hbm %s861_s1, 128 }
   0x7   :  { %p594_p0 = scmp.ne.s32.totalorder %s861_s1, %s593_s27  ;;  %p597_p1 = scmp.lt.u32.totalorder %s593_s27, %s861_s1 }
   0x9   :  { %p599_p2 = pnand %p597_p1, %p594_p0 }
   0xb   :  { %602 = shalt.err (!%p599_p2)
}
   0xc   :  { %s603_s8 = scalar_lea.vmem %s34_s22, 128  ;;  %p608_p4 = scmp.lt.s32.totalorder %s34_s22, %s34_s22 }
   0xd   :  { %p604_p3 = scmp.ne.s32.totalorder %s34_s22, %s603_s8  ;;  %p609_p5 = scmp.lt.s32.totalorder %s603_s8, %s603_s8 }
   0xf   :  { %p610_p6 = por %p609_p5, %p608_p4 }
  0x11   :  { %p611_p7 = pnand %p610_p6, %p604_p3 }
  0x13   :  { %614 = shalt.err (!%p611_p7)
}
  0x14   :  { %36 = dma.hbm_to_vmem [thread:$0]  %s861_s1, 128, %s34_s22, [#allocation6]  }
  0x15   :  { %s615_s13 = scalar_lea.hbm %s860_s0, 128 }
  0x16   :  { %p616_p8 = scmp.ne.s32.totalorder %s860_s0, %s615_s13  ;;  %p619_p9 = scmp.lt.u32.totalorder %s615_s13, %s860_s0 }
  0x18   :  { %p621_p10 = pnand %p619_p9, %p616_p8 }
  0x1a   :  { %624 = shalt.err (!%p621_p10)
}
  0x1b   :  { %s625_s18 = scalar_lea.vmem %s24_s24, 128  ;;  %p630_p12 = scmp.lt.s32.totalorder %s24_s24, %s24_s24 }
  0x1c   :  { %p626_p11 = scmp.ne.s32.totalorder %s24_s24, %s625_s18  ;;  %p631_p13 = scmp.lt.s32.totalorder %s625_s18, %s625_s18 }
  0x1e   :  { %p632_p0 = por %p631_p13, %p630_p12 }
  0x20   :  { %p633_p1 = pnand %p632_p0, %p626_p11 }
  0x22   :  { %636 = shalt.err (!%p633_p1)
}
  0x23   :  { %26 = dma.hbm_to_vmem [thread:$0]  %s860_s0, 128, %s24_s24, [#allocation3]  }
  0x24   :  { %s737_s20 = smov [#allocation7]   ;;  %s738_s22 = smov [#allocation8]  }
  0x25   :  { %s43_s21 = sshll.u32 %s737_s20, 4  ;;  %s52_s23 = sshll.u32 %s738_s22, 4  ;;  %s44_s21 = int_to_ptr.vmem [resolvable:$true] %s43_s21  ;;  %s802_s23 = int_to_ptr.vmem [resolvable:$true] %s52_s23 }
  0x26   :  { %s637_s27 = scalar_lea.hbm %s862_s2, 128 }
  0x27   :  { %p638_p2 = scmp.ne.s32.totalorder %s862_s2, %s637_s27  ;;  %p641_p3 = scmp.lt.u32.totalorder %s637_s27, %s862_s2 }
  0x29   :  { %p643_p4 = pnand %p641_p3, %p638_p2 }
  0x2b   :  { %646 = shalt.err (!%p643_p4)
}
  0x2c   :  { %s647_s0 = scalar_lea.vmem %s44_s21, 128  ;;  %p652_p6 = scmp.lt.s32.totalorder %s44_s21, %s44_s21 }
  0x2d   :  { %p648_p5 = scmp.ne.s32.totalorder %s44_s21, %s647_s0  ;;  %p653_p7 = scmp.lt.s32.totalorder %s647_s0, %s647_s0 }
  0x2f   :  { %p654_p8 = por %p653_p7, %p652_p6 }
  0x31   :  { %p655_p9 = pnand %p654_p8, %p648_p5 }
  0x33   :  { %658 = shalt.err (!%p655_p9)
}
  0x34   :  { %46 = dma.hbm_to_vmem [thread:$0]  %s862_s2, 128, %s44_s21, [#allocation6]  }
  0x35   :  { %s659_s11 = scalar_lea.hbm %s863_s3, 4608 }
  0x36   :  { %p660_p10 = scmp.ne.s32.totalorder %s863_s3, %s659_s11  ;;  %p663_p11 = scmp.lt.u32.totalorder %s659_s11, %s863_s3 }
  0x38   :  { %p665_p12 = pnand %p663_p11, %p660_p10 }
  0x3a   :  { %668 = shalt.err (!%p665_p12)
}
  0x3b   :  { %s669_s16 = scalar_lea.vmem %s802_s23, 4608  ;;  %p674_p0 = scmp.lt.s32.totalorder %s802_s23, %s802_s23 }
  0x3c   :  { %p670_p13 = scmp.ne.s32.totalorder %s802_s23, %s669_s16  ;;  %p675_p1 = scmp.lt.s32.totalorder %s669_s16, %s669_s16 }
  0x3e   :  { %p676_p2 = por %p675_p1, %p674_p0 }
  0x40   :  { %p677_p3 = pnand %p676_p2, %p670_p13 }
  0x42   :  { %680 = shalt.err (!%p677_p3)
}
  0x43   :  { %s739_s2 = smov 256   ;;  %s740_s17 = smov 16  }
  0x44   :  { %58 = dma.hbm_to_vmem [thread:$0]  %s863_s3, 4608, %s802_s23, [#allocation9], %s739_s2, %s739_s2, %s740_s17  }
  0x45   :  { %725 = dma.done.wait [#allocation3], 128  }
  0x46   :  { %726 = vsyncadd [#allocation3], 4294967168 }
  0x47   :  { %727 = dma.done.wait [#allocation6], 256  }
  0x48   :  { %728 = vsyncadd [#allocation6], 4294967040 }
  0x49   :  { %729 = dma.done.wait [#allocation9], 4608  }
  0x4a   :  { %730 = vsyncadd [#allocation9], 4294962688  ;;  %v521_v0 = vld [vmem:[#allocation8 + $0x4] ss:$16 sps:$4 sm:$0xff]   ;;  %v523_v1 = vld [vmem:[#allocation8] ss:$16 sps:$4 sm:$0xff]   ;;  %v115_v39 = vlaneseq }
  0x4b   :  { %325 = vmatprep.subr.bf16.mxu0 %v521_v0  ;;  %v524_v2 = vld [vmem:[#allocation8 + $0x24] ss:$16 sps:$4 sm:$0xff]   ;;  %v526_v3 = vld [vmem:[#allocation8 + $0x20] ss:$16 sps:$4 sm:$0xff]   ;;  %v532_v5 = vld [vmem:[#allocation8 + $0xc] ss:$16 sps:$4 sm:$0xff]  }
  0x4c   :  { %326 = vmatpush1.bf16.msra.mxu0 %v523_v1  ;;  %v527_v4 = vld [vmem:[#allocation8 + $0x44] ss:$16 sps:$4 sm:$0xff]   ;;  %v535_v6 = vld [vmem:[#allocation8 + $0x8] ss:$16 sps:$4 sm:$0xff]   ;;  %v529_v7 = vld [vmem:[#allocation8 + $0x40] ss:$16 sps:$4 sm:$0xff]   ;;  %366 = vmatprep.subr.bf16.mxu1 %v532_v5 }
  0x4d   :  { %327 = vmatprep.subr.bf16.mxu0 %v524_v2  ;;  %v530_v8 = vld [vmem:[#allocation8 + $0x64] ss:$16 sps:$4 sm:$0xff]   ;;  %367 = vmatpush1.bf16.msra.mxu1 %v535_v6  ;;  %v538_v9 = vld [vmem:[#allocation8 + $0x2c] ss:$16 sps:$4 sm:$0xff]   ;;  %v541_v10 = vld [vmem:[#allocation8 + $0x28] ss:$16 sps:$4 sm:$0xff]  }
  0x4e   :  { %368 = vmatprep.subr.bf16.mxu1 %v538_v9  ;;  %v534_v11 = vld [vmem:[#allocation8 + $0x60] ss:$16 sps:$4 sm:$0xff]   ;;  %v536_v12 = vld [vmem:[#allocation8 + $0x84] ss:$16 sps:$4 sm:$0xff]   ;;  %v544_v13 = vld [vmem:[#allocation8 + $0x4c] ss:$16 sps:$4 sm:$0xff]  }
  0x4f   :  { %v547_v14 = vld [vmem:[#allocation8 + $0x48] ss:$16 sps:$4 sm:$0xff]   ;;  %v550_v15 = vld [vmem:[#allocation8 + $0x6c] ss:$16 sps:$4 sm:$0xff]   ;;  %v540_v16 = vld [vmem:[#allocation8 + $0x80] ss:$16 sps:$4 sm:$0xff]  }
  0x50   :  { %328 = vmatpush1.bf16.msra.mxu0 %v526_v3  ;;  %v542_v17 = vld [vmem:[#allocation8 + $0xa4] ss:$16 sps:$4 sm:$0xff]   ;;  %v553_v18 = vld [vmem:[#allocation8 + $0x68] ss:$16 sps:$4 sm:$0xff]   ;;  %v556_v19 = vld [vmem:[#allocation8 + $0x8c] ss:$16 sps:$4 sm:$0xff]  }
  0x51   :  { %329 = vmatprep.subr.bf16.mxu0 %v527_v4  ;;  %369 = vmatpush1.bf16.msra.mxu1 %v541_v10  ;;  %v546_v20 = vld [vmem:[#allocation8 + $0xa0] ss:$16 sps:$4 sm:$0xff]   ;;  %v548_v21 = vld [vmem:[#allocation8 + $0xc4] ss:$16 sps:$4 sm:$0xff]   ;;  %v559_v22 = vld [vmem:[#allocation8 + $0x88] ss:$16 sps:$4 sm:$0xff]  }
  0x52   :  { %370 = vmatprep.subr.bf16.mxu1 %v544_v13  ;;  %v76_v23 = vld [vmem:[#allocation2] sm:$0xff]  ;;  %vm321_vm0 = vcmask 130048   ;;  %v552_v26 = vld [vmem:[#allocation8 + $0xc0] ss:$16 sps:$4 sm:$0xff]   ;;  %v554_v27 = vld [vmem:[#allocation8 + $0xe4] ss:$16 sps:$4 sm:$0xff]  }
  0x53   :  { %v562_v24 = vld [vmem:[#allocation8 + $0xac] ss:$16 sps:$4 sm:$0xff]   ;;  %v471_v25 = vcombine.high %v76_v23, %v76_v23  ;;  %v565_v28 = vld [vmem:[#allocation8 + $0xa8] ss:$16 sps:$4 sm:$0xff]   ;;  %v558_v30 = vld [vmem:[#allocation8 + $0xe0] ss:$16 sps:$4 sm:$0xff]   ;;  %v470_v37 = vcombine.low %v76_v23, %v76_v23 }
  0x54   :  { %330 = vmatpush1.bf16.msra.mxu0 %v529_v7  ;;  %v568_v29 = vld [vmem:[#allocation8 + $0xcc] ss:$16 sps:$4 sm:$0xff]   ;;  %v560_v31 = vld [vmem:[#allocation8 + $0x104] ss:$16 sps:$4 sm:$0xff]   ;;  %v570_v32 = vld [vmem:[#allocation8 + $0xc8] ss:$16 sps:$4 sm:$0xff]  }
  0x55   :  { %331 = vmatprep.subr.bf16.mxu0 %v530_v8  ;;  %371 = vmatpush1.bf16.msra.mxu1 %v547_v14  ;;  %v571_v33 = vld [vmem:[#allocation8 + $0xec] ss:$16 sps:$4 sm:$0xff]   ;;  %v564_v34 = vld [vmem:[#allocation8 + $0x100] ss:$16 sps:$4 sm:$0xff]   ;;  %v573_v35 = vld [vmem:[#allocation8 + $0xe8] ss:$16 sps:$4 sm:$0xff]  }
  0x56   :  { %372 = vmatprep.subr.bf16.mxu1 %v550_v15  ;;  %508 = vmatprep.mubr.msk.bf16.mxu0 %vm321_vm0, %v471_v25  ;;  %v574_v36 = vld [vmem:[#allocation8 + $0x10c] ss:$16 sps:$4 sm:$0xff]   ;;  %v576_v38 = vld [vmem:[#allocation8 + $0x108] ss:$16 sps:$4 sm:$0xff]   ;;  %v116_v40 = vshrl.u32 %v115_v39, 7 }
  0x57   :  { %509 = vmatprep.mubr.msk.bf16.mxu1 %vm321_vm0, %v471_v25  ;;  %v113_v42 = vld [vmem:[%s864_s4] sm:$0xf]  ;;  %v75_v7 = vld [vmem:[#allocation7] sm:$0xff]  ;;  %s741_s4 = smov [#allocation11]  }
  0x58   :  { %332 = vmatpush1.bf16.msra.mxu0 %v534_v11  ;;  %v117_v41 = vsub.s32 0, %v116_v40  ;;  %v121_v43 = vsub.s32 1, %v116_v40  ;;  %v129_v46 = vsub.s32 3, %v116_v40  ;;  %v125_v56 = vsub.s32 2, %v116_v40  ;;  %s455_s20 = sshll.u32 %s741_s4, 4  ;;  %s456_s20 = int_to_ptr.vmem [resolvable:$true] %s455_s20 }
  0x59   :  { %333 = vmatprep.subr.bf16.mxu0 %v536_v12  ;;  %373 = vmatpush1.bf16.msra.mxu1 %v553_v18  ;;  %s681_s21 = scalar_lea.vmem %s456_s20, 128  ;;  %p686_p5 = scmp.lt.s32.totalorder %s456_s20, %s456_s20 }
  0x5a   :  { %374 = vmatprep.subr.bf16.mxu1 %v556_v19  ;;  %v118_v44 = vrot.slane %v113_v42, %v117_v41  ;;  %v122_v45 = vrot.slane %v113_v42, %v121_v43  ;;  %v130_v54 = vrot.slane %v113_v42, %v129_v46  ;;  %v126_v61 = vrot.slane %v113_v42, %v125_v56  ;;  %p682_p4 = scmp.ne.s32.totalorder %s456_s20, %s681_s21  ;;  %p687_p6 = scmp.lt.s32.totalorder %s681_s21, %s681_s21 }
  0x5c   :  { %334 = vmatpush1.bf16.msra.mxu0 %v540_v16  ;;  %p688_p7 = por %p687_p6, %p686_p5 }
  0x5d   :  { %335 = vmatprep.subr.bf16.mxu0 %v542_v17  ;;  %375 = vmatpush1.bf16.msra.mxu1 %v559_v22 }
  0x5e   :  { %376 = vmatprep.subr.bf16.mxu1 %v562_v24  ;;  %p689_p8 = pnand %p688_p7, %p682_p4 }
  0x60   :  { %336 = vmatpush1.bf16.msra.mxu0 %v546_v20 }
  0x61   :  { %337 = vmatprep.subr.bf16.mxu0 %v548_v21  ;;  %377 = vmatpush1.bf16.msra.mxu1 %v565_v28 }
  0x62   :  { %378 = vmatprep.subr.bf16.mxu1 %v568_v29 }
  0x64   :  { %338 = vmatpush1.bf16.msra.mxu0 %v552_v26 }
  0x65   :  { %339 = vmatprep.subr.bf16.mxu0 %v554_v27  ;;  %379 = vmatpush1.bf16.msra.mxu1 %v570_v32 }
  0x66   :  { %380 = vmatprep.subr.bf16.mxu1 %v571_v33 }
  0x68   :  { %340 = vmatpush1.bf16.msra.mxu0 %v558_v30 }
  0x69   :  { %341 = vmatprep.subr.bf16.mxu0 %v560_v31  ;;  %381 = vmatpush1.bf16.msra.mxu1 %v573_v35 }
  0x6a   :  { %382 = vmatprep.subr.bf16.mxu1 %v574_v36 }
  0x6c   :  { %342 = vmatpush1.bf16.msra.mxu0 %v564_v34 }
  0x6d   :  { %383 = vmatpush1.bf16.msra.mxu1 %v576_v38 }
  0x6f   :  { %358 = vmatmul.mubr.bf16.vlgmr.msra.gmra.mrb[0].mxu0 %v470_v37 }
  0x70   :  { %399 = vmatmul.mubr.bf16.vlgmr.msra.gmra.mrb[0].mxu1 %v470_v37 }
 0x142   :  { %v359_v47 = vpop.f32.mrb[0].mxu0 }
 0x143   :  { %v360_v48 = vadd.f32 %v359_v47, %v118_v44  ;;  %v361_v49 = vpop.f32.mrb[1].mxu0  ;;  %v400_v57 = vpop.f32.mrb[0].mxu1 }
 0x144   :  { %v362_v50 = vadd.f32 %v361_v49, %v122_v45  ;;  %v363_v51 = vpop.f32.mrb[2].mxu0  ;;  %v402_v58 = vpop.f32.mrb[1].mxu1  ;;  %v401_v0 = vadd.f32 %v400_v57, %v126_v61 }
 0x145   :  { %v510_v52 = vmul.f32 -1.442695, %v360_v48  ;;  %v364_v53 = vpop.f32.mrb[3].mxu0  ;;  %v403_v59 = vadd.f32 %v402_v58, %v130_v54  ;;  %v404_v60 = vpop.f32.mrb[2].mxu1 }
 0x146   :  { %v511_v55 = vmul.f32 -1.442695, %v362_v50  ;;  %v405_v62 = vpop.f32.mrb[3].mxu1 }
 0x147   :  { %577 = vpow2.f32 %v510_v52  ;;  %v512_v63 = vmul.f32 -1.442695, %v403_v59 }
 0x148   :  { %579 = vpow2.f32 %v511_v55 }
 0x149   :  { %581 = vpow2.f32 %v512_v63 }
 0x14a   :  { %583 = vtanh.f32 %v401_v0 }
 0x151   :  { %v578_v1 = vpop.eup %577 }
 0x152   :  { %v580_v2 = vpop.eup %579  ;;  %v410_v3 = vadd.f32 1.0, %v578_v1 }
 0x153   :  { %v416_v4 = vadd.f32 1.0, %v580_v2  ;;  %v582_v5 = vpop.eup %581 }
 0x154   :  { %585 = vrcp.f32 %v410_v3  ;;  %v584_v6 = vpop.eup %583  ;;  %v423_v9 = vadd.f32 1.0, %v582_v5 }
 0x155   :  { %587 = vrcp.f32 %v416_v4 }
 0x156   :  { %589 = vrcp.f32 %v423_v9 }
 0x15e   :  { %v586_v8 = vpop.eup %585 }
 0x15f   :  { %v588_v10 = vpop.eup %587  ;;  %v427_v11 = vmul.f32 %v586_v8, %v584_v6 }
 0x160   :  { %v426_v12 = vmul.f32 %v588_v10, %v75_v7 }
 0x162   :  { %v428_v13 = vadd.f32 %v427_v11, %v426_v12 }
 0x164   :  { %591 = vtanh.f32 %v428_v13  ;;  %v435_v14 = vsub.f32 %v75_v7, %v428_v13 }
 0x166   :  { %v436_v15 = vmul.f32 0.1, %v435_v14 }
 0x168   :  { %v437_v16 = vadd.f32 %v436_v15, %v428_v13 }
 0x16a   :  { %438 = vst [vmem:[#allocation11] sm:$0xff] %v437_v16 }
 0x16b   :  { %692 = shalt.err (!%p689_p8)
}
 0x16c   :  { %s693_s25 = scalar_lea.hbm %s866_s6, 128 }
 0x16d   :  { %p694_p9 = scmp.ne.s32.totalorder %s866_s6, %s693_s25  ;;  %p697_p10 = scmp.lt.u32.totalorder %s693_s25, %s866_s6 }
 0x16f   :  { %p699_p11 = pnand %p697_p10, %p694_p9 }
 0x171   :  { %702 = shalt.err (!%p699_p11)
}
 0x172   :  { %458 = dma.vmem_to_hbm [thread:$0]  %s456_s20, 128, %s866_s6, [#allocation12]   ;;  %v590_v17 = vpop.eup %589  ;;  %v74_v19 = vld [vmem:[#allocation5] sm:$0xff] }
 0x173   :  { %v592_v18 = vpop.eup %591  ;;  %s742_s0 = smov [#allocation10]  }
 0x174   :  { %v430_v20 = vmul.f32 %v592_v18, %v590_v17  ;;  %s445_s24 = sshll.u32 %s742_s0, 4  ;;  %s446_s24 = int_to_ptr.vmem [resolvable:$true] %s445_s24 }
 0x175   :  { %s703_s8 = scalar_lea.vmem %s446_s24, 128  ;;  %p708_p13 = scmp.lt.s32.totalorder %s446_s24, %s446_s24 }
 0x176   :  { %v431_v21 = vsub.f32 %v74_v19, %v430_v20  ;;  %p704_p12 = scmp.ne.s32.totalorder %s446_s24, %s703_s8  ;;  %p709_p0 = scmp.lt.s32.totalorder %s703_s8, %s703_s8 }
 0x178   :  { %v432_v22 = vmul.f32 0.1, %v431_v21  ;;  %p710_p1 = por %p709_p0, %p708_p13 }
 0x17a   :  { %v433_v23 = vadd.f32 %v432_v22, %v430_v20  ;;  %p711_p2 = pnand %p710_p1, %p704_p12 }
 0x17c   :  { %434 = vst [vmem:[#allocation10] sm:$0xff] %v433_v23 }
 0x17d   :  { %714 = shalt.err (!%p711_p2)
}
 0x17e   :  { %s715_s10 = scalar_lea.hbm %s865_s5, 128 }
 0x17f   :  { %p716_p3 = scmp.ne.s32.totalorder %s865_s5, %s715_s10  ;;  %p719_p4 = scmp.lt.u32.totalorder %s715_s10, %s865_s5 }
 0x181   :  { %p721_p5 = pnand %p719_p4, %p716_p3 }
 0x183   :  { %724 = shalt.err (!%p721_p5)
}
 0x184   :  { %448 = dma.vmem_to_hbm [thread:$0]  %s446_s24, 128, %s865_s5, [#allocation4]  }
 0x185   :  { %731 = dma.done.wait [#allocation4], 128  }
 0x186   :  { %732 = vsyncadd [#allocation4], 4294967168 }
 0x187   :  { %733 = dma.done.wait [#allocation12], 128  }
 0x188   :  { %734 = vsyncadd [#allocation12], 4294967168 }
 0x189   :  { %465 = vsyncpa [#allocation3], 1 }
 0x18a   :  { %466 = vsyncpa [#allocation6], 1 }
 0x18b   :  { %467 = vsyncpa [#allocation9], 1 }
 0x18c   :  { %468 = vsyncpa [#allocation4], 1 }
 0x18d   :  { %469 = vsyncpa [#allocation12], 1 }

</bundles_post_ra>
